<compile_context>
chip_gen: v5e
topology: v5e:2x2
jax: 0.10.0
libtpu: 0.0.40
codegen_flags: <defaults>
</compile_context>

<pallas_src>
import jax
import jax.numpy as jnp
from jax import lax
from jax.experimental import pallas as pl
from jax.experimental.pallas import tpu as pltpu


TB = 8       # batch tile (one f32 sublane group)
C_PAD = 128  # lane-dense padded output width


# ----------------------------- Pallas kernel ------------------------------- #
def per_schema_rnn_kernel(
    x_ref,       # (T*TB, E)   bf16  time-major flat embeds for this batch tile
    wih_f_ref,   # (E, 4H)     bf16  forward  input->gates   (gate order i,f,o,g)
    whh_f_ref,   # (H, 4H)     bf16  forward  hidden->gates
    b_f_ref,     # (1, 4H)     f32   forward  fused bias (b_ih + b_hh)
    wih_b_ref,   # (E, 4H)     bf16  backward input->gates
    b_b_ref,     # (1, 4H)     f32   backward fused bias
    wfc_ref,     # (2H, C_PAD) bf16  dense head (zero-padded lanes)
    bfc_ref,     # (1, C_PAD)  f32   dense bias (-1e30 in padded lanes)
    out_ref,     # (TB, C_PAD) f32   softmax probabilities (lane-dense)
    xg_ref,      # (T*TB, 4H)  f32   VMEM scratch: precomputed x@Wih + b slab
):
    tb, _ = out_ref.shape
    t_tb, _ = x_ref.shape
    T = t_tb // tb
    H = whh_f_ref.shape[0]
    H3 = 3 * H

    # ---- hoisted input projection (forward direction): one big matmul,
    # bias folded in once, result parked in VMEM scratch.
    xg_ref[...] = (
        jnp.dot(x_ref[...], wih_f_ref[...], preferred_element_type=jnp.float32)
        + b_f_ref[...]
    )

    whh_f = whh_f_ref[...]  # (H, 4H) bf16, resident in vregs/VMEM

    def gate_apply(gates, c):
        # gate order [i, f, o, g]: one sigmoid over 3H lanes + one tanh over H.
        s = jax.nn.sigmoid(gates[:, :H3])
        i = s[:, 0 * H:1 * H]
        f = s[:, 1 * H:2 * H]
        o = s[:, 2 * H:H3]
        g = jnp.tanh(gates[:, H3:])
        c_new = f * c + i * g
        h_new = o * jnp.tanh(c_new)
        return h_new, c_new

    zeros = jnp.zeros((tb, H), jnp.float32)

    # ---- forward recurrence: only h @ Whh on the serial chain; unrolled.
    def fwd_step(t, carry):
        h, c = carry
        row = pl.multiple_of(t * tb, tb)
        gates = xg_ref[pl.ds(row, tb), :] + jnp.dot(
            h.astype(jnp.bfloat16), whh_f, preferred_element_type=jnp.float32
        )
        return gate_apply(gates, c)

    h_fwd, _ = lax.fori_loop(0, T, fwd_step, (zeros, zeros), unroll=True)

    # ---- backward direction: lstm_out[:, -1, H:] is the backward LSTM after
    # its FIRST step (input x_{T-1}, zero initial state), so h_prev @ Whh_b == 0
    # and Whh_b is not needed at all.
    x_last = x_ref[pl.ds((T - 1) * tb, tb), :]
    gates_b = (
        jnp.dot(x_last, wih_b_ref[...], preferred_element_type=jnp.float32)
        + b_b_ref[...]
    )
    h_bwd, _ = gate_apply(gates_b, zeros)

    # ---- dropout (eval identity) + dense head + softmax (over 4 real lanes;
    # padded lanes carry -1e30 bias -> exp underflows to exactly 0).
    feat = jnp.concatenate([h_fwd, h_bwd], axis=1).astype(jnp.bfloat16)  # (TB, 2H)
    logits = (
        jnp.dot(feat, wfc_ref[...], preferred_element_type=jnp.float32)
        + bfc_ref[...]
    )                                                                    # (TB, C_PAD)
    m = jnp.max(logits, axis=1, keepdims=True)
    e = jnp.exp(logits - m)
    out_ref[...] = e / jnp.sum(e, axis=1, keepdims=True)


# ----------------------- wrapper-side weight preparation -------------------- #
def _reorder_ifgo_to_ifog(w):
    # PyTorch packs gate rows as [i, f, g, o]; kernel wants [i, f, o, g].
    i, f, g, o = jnp.split(w, 4, axis=0)
    return jnp.concatenate([i, f, o, g], axis=0)


def prepare_kernel_params(p, hidden, num_labels, lane_pad=C_PAD):
    H = hidden

    def gate_mat(w):  # (4H, in) PyTorch layout -> (in, 4H) bf16, gate order i,f,o,g
        return _reorder_ifgo_to_ifog(w).T.astype(jnp.bfloat16)

    def gate_bias(b_ih, b_hh):  # fused, (1, 4H) f32
        return _reorder_ifgo_to_ifog((b_ih + b_hh)[:, None]).T

    wfc = jnp.zeros((2 * H, lane_pad), jnp.float32).at[:, :num_labels].set(p["w_fc"].T)
    bfc = jnp.full((1, lane_pad), -1e30, jnp.float32).at[0, :num_labels].set(p["b_fc"])
    return {
        "wih_f": gate_mat(p["w_ih_f"]),
        "whh_f": gate_mat(p["w_hh_f"]),
        "b_f": gate_bias(p["b_ih_f"], p["b_hh_f"]),
        "wih_b": gate_mat(p["w_ih_b"]),
        "b_b": gate_bias(p["b_ih_b"], p["b_hh_b"]),
        "wfc": wfc.astype(jnp.bfloat16),
        "bfc": bfc,
    }


# ------------------------------ JAX wrapper -------------------------------- #
def per_schema_rnn_forward(token_ids, params, hidden, num_labels):
    """token_ids: (B, T) int32. Returns (B, num_labels) f32 probabilities."""
    kp = prepare_kernel_params(params, hidden, num_labels)

    emb = params["embedding"]
    x = emb[token_ids]  # (B, T, E)  embedding gather (glue, outside kernel)
    B, T, E = x.shape
    H = hidden

    # Pad batch to a full sublane tile and lay out per batch-tile as a
    # time-major flat slab: rows [t*TB : (t+1)*TB] are timestep t.
    B_pad = ((B + TB - 1) // TB) * TB
    G = B_pad // TB
    x = jnp.pad(x, ((0, B_pad - B), (0, 0), (0, 0)))
    x = x.reshape(G, TB, T, E).transpose(0, 2, 1, 3).reshape(G, T * TB, E)
    x = x.astype(jnp.bfloat16)

    def full_spec(shape):
        return pl.BlockSpec(shape, lambda g: (0,) * len(shape))

    # TODO(synk): if T/B/E scale up (real GloVe dims, long sequences), block the
    # time axis of the embeds slab and set vmem_limit_bytes for v7x's 64 MiB VMEM.
    out = pl.pallas_call(
        per_schema_rnn_kernel,
        out_shape=jax.ShapeDtypeStruct((B_pad, C_PAD), jnp.float32),
        grid=(G,),
        in_specs=[
            pl.BlockSpec((None, T * TB, E), lambda g: (g, 0, 0)),  # embeds tile
            full_spec((E, 4 * H)),
            full_spec((H, 4 * H)),
            full_spec((1, 4 * H)),
            full_spec((E, 4 * H)),
            full_spec((1, 4 * H)),
            full_spec((2 * H, C_PAD)),
            full_spec((1, C_PAD)),
        ],
        out_specs=pl.BlockSpec((TB, C_PAD), lambda g: (g, 0)),
        scratch_shapes=[pltpu.VMEM((T * TB, 4 * H), jnp.float32)],
        compiler_params=pltpu.CompilerParams(dimension_semantics=("parallel",)),
    )(
        x,
        kp["wih_f"], kp["whh_f"], kp["b_f"],
        kp["wih_b"], kp["b_b"],
        kp["wfc"], kp["bfc"],
    )
    return out[:B, :num_labels]


# ---------------------- pure-JAX reference (for check) --------------------- #
def reference_forward(token_ids, params):
    """Full-fidelity f32 bidirectional LSTM in PyTorch weight layout."""
    emb = params["embedding"]
    x = emb[token_ids]  # (B, T, E)
    B, T, E = x.shape
    H = params["w_hh_f"].shape[1]

    def cell(x_t, h, c, w_ih, w_hh, b_ih, b_hh):
        gates = x_t @ w_ih.T + h @ w_hh.T + b_ih + b_hh  # [i, f, g, o]
        i = jax.nn.sigmoid(gates[:, 0 * H:1 * H])
        f = jax.nn.sigmoid(gates[:, 1 * H:2 * H])
        g = jnp.tanh(gates[:, 2 * H:3 * H])
        o = jax.nn.sigmoid(gates[:, 3 * H:4 * H])
        c_new = f * c + i * g
        return o * jnp.tanh(c_new), c_new

    zeros = jnp.zeros((B, H), jnp.float32)

    def scan_dir(xs, w_ih, w_hh, b_ih, b_hh):
        def step(carry, x_t):
            h, c = carry
            h, c = cell(x_t, h, c, w_ih, w_hh, b_ih, b_hh)
            return (h, c), h
        _, hs = lax.scan(step, (zeros, zeros), xs)
        return hs  # (T, B, H)

    xs = jnp.transpose(x, (1, 0, 2))  # (T, B, E)
    hs_f = scan_dir(xs, params["w_ih_f"], params["w_hh_f"],
                    params["b_ih_f"], params["b_hh_f"])
    hs_b = scan_dir(xs[::-1], params["w_ih_b"], params["w_hh_b"],
                    params["b_ih_b"], params["b_hh_b"])
    hs_b = hs_b[::-1]  # align to positions 0..T-1

    lstm_last = jnp.concatenate([hs_f[-1], hs_b[-1]], axis=1)  # (B, 2H)
    logits = lstm_last @ params["w_fc"].T + params["b_fc"]
    return jax.nn.softmax(logits, axis=1)


# --------------------------------- main ------------------------------------ #
if __name__ == "__main__":
    # Small shapes consistent with the module:
    #   embed_size = hidden_size = "glove_embed_dim" -> 32, num_label_vals -> 4
    VOCAB, EMBED, HIDDEN, NUM_LABELS = 50, 32, 32, 4
    B, T = 2, 8

    key = jax.random.PRNGKey(0)
    ks = jax.random.split(key, 13)
    bound = 1.0 / (HIDDEN ** 0.5)

    def u(k, shape):
        return jax.random.uniform(k, shape, jnp.float32, -bound, bound)

    # Canonical parameters in PyTorch nn.LSTM / nn.Linear layout.
    params = {
        "embedding": jax.random.normal(ks[0], (VOCAB, EMBED), jnp.float32),
        "w_ih_f": u(ks[1], (4 * HIDDEN, EMBED)),
        "w_hh_f": u(ks[2], (4 * HIDDEN, HIDDEN)),
        "b_ih_f": u(ks[3], (4 * HIDDEN,)),
        "b_hh_f": u(ks[4], (4 * HIDDEN,)),
        "w_ih_b": u(ks[5], (4 * HIDDEN, EMBED)),
        "w_hh_b": u(ks[6], (4 * HIDDEN, HIDDEN)),
        "b_ih_b": u(ks[7], (4 * HIDDEN,)),
        "b_hh_b": u(ks[8], (4 * HIDDEN,)),
        "w_fc": u(ks[9], (NUM_LABELS, 2 * HIDDEN)),
        "b_fc": u(ks[10], (NUM_LABELS,)),
    }

    token_ids = jax.random.randint(ks[11], (B, T), 0, VOCAB, dtype=jnp.int32)

    probs = per_schema_rnn_forward(token_ids, params, HIDDEN, NUM_LABELS)
    probs = jax.block_until_ready(probs)

    ref = jax.block_until_ready(reference_forward(token_ids, params))

    assert probs.shape == (B, NUM_LABELS)
    assert bool(jnp.all(jnp.isfinite(probs)))
    assert jnp.allclose(jnp.sum(probs, axis=1), 1.0, atol=1e-5)
    # bf16 MXU operands (f32 accumulation/state) -> relaxed tolerance vs f32 ref.
    assert jnp.allclose(probs, ref, atol=2e-2, rtol=2e-2)

    print("KERNEL_OK")
</pallas_src>

<mosaic_0001>
module attributes {stable_mosaic.version = 11 : i64} {
  func.func @per_schema_rnn_kernel(%arg0: i32, %arg1: memref<1x64x32xbf16, #tpu.memory_space<vmem>>, %arg2: memref<32x128xbf16, #tpu.memory_space<vmem>>, %arg3: memref<32x128xbf16, #tpu.memory_space<vmem>>, %arg4: memref<1x128xf32, #tpu.memory_space<vmem>>, %arg5: memref<32x128xbf16, #tpu.memory_space<vmem>>, %arg6: memref<1x128xf32, #tpu.memory_space<vmem>>, %arg7: memref<64x128xbf16, #tpu.memory_space<vmem>>, %arg8: memref<1x128xf32, #tpu.memory_space<vmem>>, %arg9: memref<8x128xf32, #tpu.memory_space<vmem>>, %arg10: memref<64x128xf32, #tpu.memory_space<vmem>>) attributes {dimension_semantics = [#tpu.dimension_semantics<parallel>], iteration_bounds = array<i64: 1>, scalar_prefetch = 0 : i64, scratch_operands = 1 : i64, tpu.core_type = #tpu.core_type<tc>, window_params = [{transform_indices = @transform_0, window_bounds = array<i64: 1, 64, 32>}, {pipeline_mode = #tpu.pipeline_mode<synchronous>, transform_indices = @transform_1, window_bounds = array<i64: 32, 128>}, {pipeline_mode = #tpu.pipeline_mode<synchronous>, transform_indices = @transform_2, window_bounds = array<i64: 32, 128>}, {pipeline_mode = #tpu.pipeline_mode<synchronous>, transform_indices = @transform_3, window_bounds = array<i64: 1, 128>}, {pipeline_mode = #tpu.pipeline_mode<synchronous>, transform_indices = @transform_4, window_bounds = array<i64: 32, 128>}, {pipeline_mode = #tpu.pipeline_mode<synchronous>, transform_indices = @transform_5, window_bounds = array<i64: 1, 128>}, {pipeline_mode = #tpu.pipeline_mode<synchronous>, transform_indices = @transform_6, window_bounds = array<i64: 64, 128>}, {pipeline_mode = #tpu.pipeline_mode<synchronous>, transform_indices = @transform_7, window_bounds = array<i64: 1, 128>}, {transform_indices = @transform_8, window_bounds = array<i64: 8, 128>}]} {
    %c0 = arith.constant 0 : index
    %c0_0 = arith.constant 0 : index
    %c0_1 = arith.constant 0 : index
    %0 = vector.load %arg1[%c0, %c0_0, %c0_1] : memref<1x64x32xbf16, #tpu.memory_space<vmem>>, vector<1x64x32xbf16>
    %1 = vector.shape_cast %0 : vector<1x64x32xbf16> to vector<64x32xbf16>
    %c0_2 = arith.constant 0 : index
    %c0_3 = arith.constant 0 : index
    %2 = vector.load %arg2[%c0_2, %c0_3] : memref<32x128xbf16, #tpu.memory_space<vmem>>, vector<32x128xbf16>
    %cst = arith.constant dense<0.000000e+00> : vector<64x128xf32>
    %3 = tpu.matmul %1, %2, %cst {dimension_numbers = #tpu.dot_dimension_numbers<[1], [0], [0], [1], [0, 0, 1, 1], [], []>} : vector<64x32xbf16>, vector<32x128xbf16>, vector<64x128xf32> -> vector<64x128xf32>
    %c0_4 = arith.constant 0 : index
    %c0_5 = arith.constant 0 : index
    %4 = vector.load %arg4[%c0_4, %c0_5] : memref<1x128xf32, #tpu.memory_space<vmem>>, vector<1x128xf32>
    %5 = vector.broadcast %4 : vector<1x128xf32> to vector<64x128xf32>
    %6 = arith.addf %3, %5 : vector<64x128xf32>
    %c0_6 = arith.constant 0 : index
    %c0_7 = arith.constant 0 : index
    %7 = vector.load %arg10[%c0_6, %c0_7] : memref<64x128xf32, #tpu.memory_space<vmem>>, vector<64x128xf32>
    tpu.vector_store %arg10[%c0_6, %c0_7], %6 {strides = array<i32>} : memref<64x128xf32, #tpu.memory_space<vmem>>, vector<64x128xf32>,
    %c0_8 = arith.constant 0 : index
    %c0_9 = arith.constant 0 : index
    %8 = vector.load %arg3[%c0_8, %c0_9] : memref<32x128xbf16, #tpu.memory_space<vmem>>, vector<32x128xbf16>
    %cst_10 = arith.constant 0.000000e+00 : f32
    %9 = vector.broadcast %cst_10 : f32 to vector<8x32xf32>
    %c0_i32 = arith.constant 0 : i32
    %c8_i32 = arith.constant 8 : i32
    %10 = arith.muli %c0_i32, %c8_i32 : i32
    %11 = tpu.assume_multiple %10, 8 : i32
    %12 = arith.index_cast %11 : i32 to index
    %c0_11 = arith.constant 0 : index
    %13 = vector.load %arg10[%12, %c0_11] : memref<64x128xf32, #tpu.memory_space<vmem>>, vector<8x128xf32>
    %14 = arith.truncf %9 : vector<8x32xf32> to vector<8x32xbf16>
    %cst_12 = arith.constant dense<0.000000e+00> : vector<8x128xf32>
    %15 = tpu.matmul %14, %8, %cst_12 {dimension_numbers = #tpu.dot_dimension_numbers<[1], [0], [0], [1], [0, 0, 1, 1], [], []>} : vector<8x32xbf16>, vector<32x128xbf16>, vector<8x128xf32> -> vector<8x128xf32>
    %16 = arith.addf %13, %15 : vector<8x128xf32>
    %17 = vector.extract_strided_slice %16 {offsets = [0, 0], sizes = [8, 96], strides = [1, 1]} : vector<8x128xf32> to vector<8x96xf32>
    %18 = arith.negf %17 : vector<8x96xf32>
    %19 = math.exp %18 : vector<8x96xf32>
    %cst_13 = arith.constant 1.000000e+00 : f32
    %20 = vector.broadcast %cst_13 : f32 to vector<8x96xf32>
    %21 = arith.addf %20, %19 : vector<8x96xf32>
    %22 = arith.divf %20, %21 : vector<8x96xf32>
    %23 = vector.extract_strided_slice %22 {offsets = [0, 0], sizes = [8, 32], strides = [1, 1]} : vector<8x96xf32> to vector<8x32xf32>
    %24 = vector.extract_strided_slice %22 {offsets = [0, 32], sizes = [8, 32], strides = [1, 1]} : vector<8x96xf32> to vector<8x32xf32>
    %25 = vector.extract_strided_slice %22 {offsets = [0, 64], sizes = [8, 32], strides = [1, 1]} : vector<8x96xf32> to vector<8x32xf32>
    %26 = vector.extract_strided_slice %16 {offsets = [0, 96], sizes = [8, 32], strides = [1, 1]} : vector<8x128xf32> to vector<8x32xf32>
    %27 = math.tanh %26 : vector<8x32xf32>
    %28 = arith.mulf %24, %9 : vector<8x32xf32>
    %29 = arith.mulf %23, %27 : vector<8x32xf32>
    %30 = arith.addf %28, %29 : vector<8x32xf32>
    %31 = math.tanh %30 : vector<8x32xf32>
    %32 = arith.mulf %25, %31 : vector<8x32xf32>
    %c1_i32 = arith.constant 1 : i32
    %c8_i32_14 = arith.constant 8 : i32
    %33 = arith.muli %c1_i32, %c8_i32_14 : i32
    %34 = tpu.assume_multiple %33, 8 : i32
    %35 = arith.index_cast %34 : i32 to index
    %c0_15 = arith.constant 0 : index
    %36 = vector.load %arg10[%35, %c0_15] : memref<64x128xf32, #tpu.memory_space<vmem>>, vector<8x128xf32>
    %37 = arith.truncf %32 : vector<8x32xf32> to vector<8x32xbf16>
    %cst_16 = arith.constant dense<0.000000e+00> : vector<8x128xf32>
    %38 = tpu.matmul %37, %8, %cst_16 {dimension_numbers = #tpu.dot_dimension_numbers<[1], [0], [0], [1], [0, 0, 1, 1], [], []>} : vector<8x32xbf16>, vector<32x128xbf16>, vector<8x128xf32> -> vector<8x128xf32>
    %39 = arith.addf %36, %38 : vector<8x128xf32>
    %40 = vector.extract_strided_slice %39 {offsets = [0, 0], sizes = [8, 96], strides = [1, 1]} : vector<8x128xf32> to vector<8x96xf32>
    %41 = arith.negf %40 : vector<8x96xf32>
    %42 = math.exp %41 : vector<8x96xf32>
    %cst_17 = arith.constant 1.000000e+00 : f32
    %43 = vector.broadcast %cst_17 : f32 to vector<8x96xf32>
    %44 = arith.addf %43, %42 : vector<8x96xf32>
    %45 = arith.divf %43, %44 : vector<8x96xf32>
    %46 = vector.extract_strided_slice %45 {offsets = [0, 0], sizes = [8, 32], strides = [1, 1]} : vector<8x96xf32> to vector<8x32xf32>
    %47 = vector.extract_strided_slice %45 {offsets = [0, 32], sizes = [8, 32], strides = [1, 1]} : vector<8x96xf32> to vector<8x32xf32>
    %48 = vector.extract_strided_slice %45 {offsets = [0, 64], sizes = [8, 32], strides = [1, 1]} : vector<8x96xf32> to vector<8x32xf32>
    %49 = vector.extract_strided_slice %39 {offsets = [0, 96], sizes = [8, 32], strides = [1, 1]} : vector<8x128xf32> to vector<8x32xf32>
    %50 = math.tanh %49 : vector<8x32xf32>
    %51 = arith.mulf %47, %30 : vector<8x32xf32>
    %52 = arith.mulf %46, %50 : vector<8x32xf32>
    %53 = arith.addf %51, %52 : vector<8x32xf32>
    %54 = math.tanh %53 : vector<8x32xf32>
    %55 = arith.mulf %48, %54 : vector<8x32xf32>
    %c2_i32 = arith.constant 2 : i32
    %c8_i32_18 = arith.constant 8 : i32
    %56 = arith.muli %c2_i32, %c8_i32_18 : i32
    %57 = tpu.assume_multiple %56, 8 : i32
    %58 = arith.index_cast %57 : i32 to index
    %c0_19 = arith.constant 0 : index
    %59 = vector.load %arg10[%58, %c0_19] : memref<64x128xf32, #tpu.memory_space<vmem>>, vector<8x128xf32>
    %60 = arith.truncf %55 : vector<8x32xf32> to vector<8x32xbf16>
    %cst_20 = arith.constant dense<0.000000e+00> : vector<8x128xf32>
    %61 = tpu.matmul %60, %8, %cst_20 {dimension_numbers = #tpu.dot_dimension_numbers<[1], [0], [0], [1], [0, 0, 1, 1], [], []>} : vector<8x32xbf16>, vector<32x128xbf16>, vector<8x128xf32> -> vector<8x128xf32>
    %62 = arith.addf %59, %61 : vector<8x128xf32>
    %63 = vector.extract_strided_slice %62 {offsets = [0, 0], sizes = [8, 96], strides = [1, 1]} : vector<8x128xf32> to vector<8x96xf32>
    %64 = arith.negf %63 : vector<8x96xf32>
    %65 = math.exp %64 : vector<8x96xf32>
    %cst_21 = arith.constant 1.000000e+00 : f32
    %66 = vector.broadcast %cst_21 : f32 to vector<8x96xf32>
    %67 = arith.addf %66, %65 : vector<8x96xf32>
    %68 = arith.divf %66, %67 : vector<8x96xf32>
    %69 = vector.extract_strided_slice %68 {offsets = [0, 0], sizes = [8, 32], strides = [1, 1]} : vector<8x96xf32> to vector<8x32xf32>
    %70 = vector.extract_strided_slice %68 {offsets = [0, 32], sizes = [8, 32], strides = [1, 1]} : vector<8x96xf32> to vector<8x32xf32>
    %71 = vector.extract_strided_slice %68 {offsets = [0, 64], sizes = [8, 32], strides = [1, 1]} : vector<8x96xf32> to vector<8x32xf32>
    %72 = vector.extract_strided_slice %62 {offsets = [0, 96], sizes = [8, 32], strides = [1, 1]} : vector<8x128xf32> to vector<8x32xf32>
    %73 = math.tanh %72 : vector<8x32xf32>
    %74 = arith.mulf %70, %53 : vector<8x32xf32>
    %75 = arith.mulf %69, %73 : vector<8x32xf32>
    %76 = arith.addf %74, %75 : vector<8x32xf32>
    %77 = math.tanh %76 : vector<8x32xf32>
    %78 = arith.mulf %71, %77 : vector<8x32xf32>
    %c3_i32 = arith.constant 3 : i32
    %c8_i32_22 = arith.constant 8 : i32
    %79 = arith.muli %c3_i32, %c8_i32_22 : i32
    %80 = tpu.assume_multiple %79, 8 : i32
    %81 = arith.index_cast %80 : i32 to index
    %c0_23 = arith.constant 0 : index
    %82 = vector.load %arg10[%81, %c0_23] : memref<64x128xf32, #tpu.memory_space<vmem>>, vector<8x128xf32>
    %83 = arith.truncf %78 : vector<8x32xf32> to vector<8x32xbf16>
    %cst_24 = arith.constant dense<0.000000e+00> : vector<8x128xf32>
    %84 = tpu.matmul %83, %8, %cst_24 {dimension_numbers = #tpu.dot_dimension_numbers<[1], [0], [0], [1], [0, 0, 1, 1], [], []>} : vector<8x32xbf16>, vector<32x128xbf16>, vector<8x128xf32> -> vector<8x128xf32>
    %85 = arith.addf %82, %84 : vector<8x128xf32>
    %86 = vector.extract_strided_slice %85 {offsets = [0, 0], sizes = [8, 96], strides = [1, 1]} : vector<8x128xf32> to vector<8x96xf32>
    %87 = arith.negf %86 : vector<8x96xf32>
    %88 = math.exp %87 : vector<8x96xf32>
    %cst_25 = arith.constant 1.000000e+00 : f32
    %89 = vector.broadcast %cst_25 : f32 to vector<8x96xf32>
    %90 = arith.addf %89, %88 : vector<8x96xf32>
    %91 = arith.divf %89, %90 : vector<8x96xf32>
    %92 = vector.extract_strided_slice %91 {offsets = [0, 0], sizes = [8, 32], strides = [1, 1]} : vector<8x96xf32> to vector<8x32xf32>
    %93 = vector.extract_strided_slice %91 {offsets = [0, 32], sizes = [8, 32], strides = [1, 1]} : vector<8x96xf32> to vector<8x32xf32>
    %94 = vector.extract_strided_slice %91 {offsets = [0, 64], sizes = [8, 32], strides = [1, 1]} : vector<8x96xf32> to vector<8x32xf32>
    %95 = vector.extract_strided_slice %85 {offsets = [0, 96], sizes = [8, 32], strides = [1, 1]} : vector<8x128xf32> to vector<8x32xf32>
    %96 = math.tanh %95 : vector<8x32xf32>
    %97 = arith.mulf %93, %76 : vector<8x32xf32>
    %98 = arith.mulf %92, %96 : vector<8x32xf32>
    %99 = arith.addf %97, %98 : vector<8x32xf32>
    %100 = math.tanh %99 : vector<8x32xf32>
    %101 = arith.mulf %94, %100 : vector<8x32xf32>
    %c4_i32 = arith.constant 4 : i32
    %c8_i32_26 = arith.constant 8 : i32
    %102 = arith.muli %c4_i32, %c8_i32_26 : i32
    %103 = tpu.assume_multiple %102, 8 : i32
    %104 = arith.index_cast %103 : i32 to index
    %c0_27 = arith.constant 0 : index
    %105 = vector.load %arg10[%104, %c0_27] : memref<64x128xf32, #tpu.memory_space<vmem>>, vector<8x128xf32>
    %106 = arith.truncf %101 : vector<8x32xf32> to vector<8x32xbf16>
    %cst_28 = arith.constant dense<0.000000e+00> : vector<8x128xf32>
    %107 = tpu.matmul %106, %8, %cst_28 {dimension_numbers = #tpu.dot_dimension_numbers<[1], [0], [0], [1], [0, 0, 1, 1], [], []>} : vector<8x32xbf16>, vector<32x128xbf16>, vector<8x128xf32> -> vector<8x128xf32>
    %108 = arith.addf %105, %107 : vector<8x128xf32>
    %109 = vector.extract_strided_slice %108 {offsets = [0, 0], sizes = [8, 96], strides = [1, 1]} : vector<8x128xf32> to vector<8x96xf32>
    %110 = arith.negf %109 : vector<8x96xf32>
    %111 = math.exp %110 : vector<8x96xf32>
    %cst_29 = arith.constant 1.000000e+00 : f32
    %112 = vector.broadcast %cst_29 : f32 to vector<8x96xf32>
    %113 = arith.addf %112, %111 : vector<8x96xf32>
    %114 = arith.divf %112, %113 : vector<8x96xf32>
    %115 = vector.extract_strided_slice %114 {offsets = [0, 0], sizes = [8, 32], strides = [1, 1]} : vector<8x96xf32> to vector<8x32xf32>
    %116 = vector.extract_strided_slice %114 {offsets = [0, 32], sizes = [8, 32], strides = [1, 1]} : vector<8x96xf32> to vector<8x32xf32>
    %117 = vector.extract_strided_slice %114 {offsets = [0, 64], sizes = [8, 32], strides = [1, 1]} : vector<8x96xf32> to vector<8x32xf32>
    %118 = vector.extract_strided_slice %108 {offsets = [0, 96], sizes = [8, 32], strides = [1, 1]} : vector<8x128xf32> to vector<8x32xf32>
    %119 = math.tanh %118 : vector<8x32xf32>
    %120 = arith.mulf %116, %99 : vector<8x32xf32>
    %121 = arith.mulf %115, %119 : vector<8x32xf32>
    %122 = arith.addf %120, %121 : vector<8x32xf32>
    %123 = math.tanh %122 : vector<8x32xf32>
    %124 = arith.mulf %117, %123 : vector<8x32xf32>
    %c5_i32 = arith.constant 5 : i32
    %c8_i32_30 = arith.constant 8 : i32
    %125 = arith.muli %c5_i32, %c8_i32_30 : i32
    %126 = tpu.assume_multiple %125, 8 : i32
    %127 = arith.index_cast %126 : i32 to index
    %c0_31 = arith.constant 0 : index
    %128 = vector.load %arg10[%127, %c0_31] : memref<64x128xf32, #tpu.memory_space<vmem>>, vector<8x128xf32>
    %129 = arith.truncf %124 : vector<8x32xf32> to vector<8x32xbf16>
    %cst_32 = arith.constant dense<0.000000e+00> : vector<8x128xf32>
    %130 = tpu.matmul %129, %8, %cst_32 {dimension_numbers = #tpu.dot_dimension_numbers<[1], [0], [0], [1], [0, 0, 1, 1], [], []>} : vector<8x32xbf16>, vector<32x128xbf16>, vector<8x128xf32> -> vector<8x128xf32>
    %131 = arith.addf %128, %130 : vector<8x128xf32>
    %132 = vector.extract_strided_slice %131 {offsets = [0, 0], sizes = [8, 96], strides = [1, 1]} : vector<8x128xf32> to vector<8x96xf32>
    %133 = arith.negf %132 : vector<8x96xf32>
    %134 = math.exp %133 : vector<8x96xf32>
    %cst_33 = arith.constant 1.000000e+00 : f32
    %135 = vector.broadcast %cst_33 : f32 to vector<8x96xf32>
    %136 = arith.addf %135, %134 : vector<8x96xf32>
    %137 = arith.divf %135, %136 : vector<8x96xf32>
    %138 = vector.extract_strided_slice %137 {offsets = [0, 0], sizes = [8, 32], strides = [1, 1]} : vector<8x96xf32> to vector<8x32xf32>
    %139 = vector.extract_strided_slice %137 {offsets = [0, 32], sizes = [8, 32], strides = [1, 1]} : vector<8x96xf32> to vector<8x32xf32>
    %140 = vector.extract_strided_slice %137 {offsets = [0, 64], sizes = [8, 32], strides = [1, 1]} : vector<8x96xf32> to vector<8x32xf32>
    %141 = vector.extract_strided_slice %131 {offsets = [0, 96], sizes = [8, 32], strides = [1, 1]} : vector<8x128xf32> to vector<8x32xf32>
    %142 = math.tanh %141 : vector<8x32xf32>
    %143 = arith.mulf %139, %122 : vector<8x32xf32>
    %144 = arith.mulf %138, %142 : vector<8x32xf32>
    %145 = arith.addf %143, %144 : vector<8x32xf32>
    %146 = math.tanh %145 : vector<8x32xf32>
    %147 = arith.mulf %140, %146 : vector<8x32xf32>
    %c6_i32 = arith.constant 6 : i32
    %c8_i32_34 = arith.constant 8 : i32
    %148 = arith.muli %c6_i32, %c8_i32_34 : i32
    %149 = tpu.assume_multiple %148, 8 : i32
    %150 = arith.index_cast %149 : i32 to index
    %c0_35 = arith.constant 0 : index
    %151 = vector.load %arg10[%150, %c0_35] : memref<64x128xf32, #tpu.memory_space<vmem>>, vector<8x128xf32>
    %152 = arith.truncf %147 : vector<8x32xf32> to vector<8x32xbf16>
    %cst_36 = arith.constant dense<0.000000e+00> : vector<8x128xf32>
    %153 = tpu.matmul %152, %8, %cst_36 {dimension_numbers = #tpu.dot_dimension_numbers<[1], [0], [0], [1], [0, 0, 1, 1], [], []>} : vector<8x32xbf16>, vector<32x128xbf16>, vector<8x128xf32> -> vector<8x128xf32>
    %154 = arith.addf %151, %153 : vector<8x128xf32>
    %155 = vector.extract_strided_slice %154 {offsets = [0, 0], sizes = [8, 96], strides = [1, 1]} : vector<8x128xf32> to vector<8x96xf32>
    %156 = arith.negf %155 : vector<8x96xf32>
    %157 = math.exp %156 : vector<8x96xf32>
    %cst_37 = arith.constant 1.000000e+00 : f32
    %158 = vector.broadcast %cst_37 : f32 to vector<8x96xf32>
    %159 = arith.addf %158, %157 : vector<8x96xf32>
    %160 = arith.divf %158, %159 : vector<8x96xf32>
    %161 = vector.extract_strided_slice %160 {offsets = [0, 0], sizes = [8, 32], strides = [1, 1]} : vector<8x96xf32> to vector<8x32xf32>
    %162 = vector.extract_strided_slice %160 {offsets = [0, 32], sizes = [8, 32], strides = [1, 1]} : vector<8x96xf32> to vector<8x32xf32>
    %163 = vector.extract_strided_slice %160 {offsets = [0, 64], sizes = [8, 32], strides = [1, 1]} : vector<8x96xf32> to vector<8x32xf32>
    %164 = vector.extract_strided_slice %154 {offsets = [0, 96], sizes = [8, 32], strides = [1, 1]} : vector<8x128xf32> to vector<8x32xf32>
    %165 = math.tanh %164 : vector<8x32xf32>
    %166 = arith.mulf %162, %145 : vector<8x32xf32>
    %167 = arith.mulf %161, %165 : vector<8x32xf32>
    %168 = arith.addf %166, %167 : vector<8x32xf32>
    %169 = math.tanh %168 : vector<8x32xf32>
    %170 = arith.mulf %163, %169 : vector<8x32xf32>
    %c7_i32 = arith.constant 7 : i32
    %c8_i32_38 = arith.constant 8 : i32
    %171 = arith.muli %c7_i32, %c8_i32_38 : i32
    %172 = tpu.assume_multiple %171, 8 : i32
    %173 = arith.index_cast %172 : i32 to index
    %c0_39 = arith.constant 0 : index
    %174 = vector.load %arg10[%173, %c0_39] : memref<64x128xf32, #tpu.memory_space<vmem>>, vector<8x128xf32>
    %175 = arith.truncf %170 : vector<8x32xf32> to vector<8x32xbf16>
    %cst_40 = arith.constant dense<0.000000e+00> : vector<8x128xf32>
    %176 = tpu.matmul %175, %8, %cst_40 {dimension_numbers = #tpu.dot_dimension_numbers<[1], [0], [0], [1], [0, 0, 1, 1], [], []>} : vector<8x32xbf16>, vector<32x128xbf16>, vector<8x128xf32> -> vector<8x128xf32>
    %177 = arith.addf %174, %176 : vector<8x128xf32>
    %178 = vector.extract_strided_slice %177 {offsets = [0, 0], sizes = [8, 96], strides = [1, 1]} : vector<8x128xf32> to vector<8x96xf32>
    %179 = arith.negf %178 : vector<8x96xf32>
    %180 = math.exp %179 : vector<8x96xf32>
    %cst_41 = arith.constant 1.000000e+00 : f32
    %181 = vector.broadcast %cst_41 : f32 to vector<8x96xf32>
    %182 = arith.addf %181, %180 : vector<8x96xf32>
    %183 = arith.divf %181, %182 : vector<8x96xf32>
    %184 = vector.extract_strided_slice %183 {offsets = [0, 0], sizes = [8, 32], strides = [1, 1]} : vector<8x96xf32> to vector<8x32xf32>
    %185 = vector.extract_strided_slice %183 {offsets = [0, 32], sizes = [8, 32], strides = [1, 1]} : vector<8x96xf32> to vector<8x32xf32>
    %186 = vector.extract_strided_slice %183 {offsets = [0, 64], sizes = [8, 32], strides = [1, 1]} : vector<8x96xf32> to vector<8x32xf32>
    %187 = vector.extract_strided_slice %177 {offsets = [0, 96], sizes = [8, 32], strides = [1, 1]} : vector<8x128xf32> to vector<8x32xf32>
    %188 = math.tanh %187 : vector<8x32xf32>
    %189 = arith.mulf %185, %168 : vector<8x32xf32>
    %190 = arith.mulf %184, %188 : vector<8x32xf32>
    %191 = arith.addf %189, %190 : vector<8x32xf32>
    %192 = math.tanh %191 : vector<8x32xf32>
    %193 = arith.mulf %186, %192 : vector<8x32xf32>
    %c8_i32_42 = arith.constant 8 : i32
    %c0_43 = arith.constant 0 : index
    %c56 = arith.constant 56 : index
    %c0_44 = arith.constant 0 : index
    %194 = vector.load %arg1[%c0_43, %c56, %c0_44] : memref<1x64x32xbf16, #tpu.memory_space<vmem>>, vector<1x8x32xbf16>
    %195 = vector.shape_cast %194 : vector<1x8x32xbf16> to vector<8x32xbf16>
    %c0_45 = arith.constant 0 : index
    %c0_46 = arith.constant 0 : index
    %196 = vector.load %arg5[%c0_45, %c0_46] : memref<32x128xbf16, #tpu.memory_space<vmem>>, vector<32x128xbf16>
    %cst_47 = arith.constant dense<0.000000e+00> : vector<8x128xf32>
    %197 = tpu.matmul %195, %196, %cst_47 {dimension_numbers = #tpu.dot_dimension_numbers<[1], [0], [0], [1], [0, 0, 1, 1], [], []>} : vector<8x32xbf16>, vector<32x128xbf16>, vector<8x128xf32> -> vector<8x128xf32>
    %c0_48 = arith.constant 0 : index
    %c0_49 = arith.constant 0 : index
    %198 = vector.load %arg6[%c0_48, %c0_49] : memref<1x128xf32, #tpu.memory_space<vmem>>, vector<1x128xf32>
    %199 = vector.broadcast %198 : vector<1x128xf32> to vector<8x128xf32>
    %200 = arith.addf %197, %199 : vector<8x128xf32>
    %201 = vector.extract_strided_slice %200 {offsets = [0, 0], sizes = [8, 96], strides = [1, 1]} : vector<8x128xf32> to vector<8x96xf32>
    %202 = arith.negf %201 : vector<8x96xf32>
    %203 = math.exp %202 : vector<8x96xf32>
    %cst_50 = arith.constant 1.000000e+00 : f32
    %204 = vector.broadcast %cst_50 : f32 to vector<8x96xf32>
    %205 = arith.addf %204, %203 : vector<8x96xf32>
    %206 = arith.divf %204, %205 : vector<8x96xf32>
    %207 = vector.extract_strided_slice %206 {offsets = [0, 0], sizes = [8, 32], strides = [1, 1]} : vector<8x96xf32> to vector<8x32xf32>
    %208 = vector.extract_strided_slice %206 {offsets = [0, 32], sizes = [8, 32], strides = [1, 1]} : vector<8x96xf32> to vector<8x32xf32>
    %209 = vector.extract_strided_slice %206 {offsets = [0, 64], sizes = [8, 32], strides = [1, 1]} : vector<8x96xf32> to vector<8x32xf32>
    %210 = vector.extract_strided_slice %200 {offsets = [0, 96], sizes = [8, 32], strides = [1, 1]} : vector<8x128xf32> to vector<8x32xf32>
    %211 = math.tanh %210 : vector<8x32xf32>
    %212 = arith.mulf %208, %9 : vector<8x32xf32>
    %213 = arith.mulf %207, %211 : vector<8x32xf32>
    %214 = arith.addf %212, %213 : vector<8x32xf32>
    %215 = math.tanh %214 : vector<8x32xf32>
    %216 = arith.mulf %209, %215 : vector<8x32xf32>
    %217 = tpu.concatenate %193, %216 in 1 : vector<8x32xf32>, vector<8x32xf32> -> vector<8x64xf32>
    %218 = arith.truncf %217 : vector<8x64xf32> to vector<8x64xbf16>
    %c0_51 = arith.constant 0 : index
    %c0_52 = arith.constant 0 : index
    %219 = vector.load %arg7[%c0_51, %c0_52] : memref<64x128xbf16, #tpu.memory_space<vmem>>, vector<64x128xbf16>
    %cst_53 = arith.constant dense<0.000000e+00> : vector<8x128xf32>
    %220 = tpu.matmul %218, %219, %cst_53 {dimension_numbers = #tpu.dot_dimension_numbers<[1], [0], [0], [1], [0, 0, 1, 1], [], []>} : vector<8x64xbf16>, vector<64x128xbf16>, vector<8x128xf32> -> vector<8x128xf32>
    %c0_54 = arith.constant 0 : index
    %c0_55 = arith.constant 0 : index
    %221 = vector.load %arg8[%c0_54, %c0_55] : memref<1x128xf32, #tpu.memory_space<vmem>>, vector<1x128xf32>
    %222 = vector.broadcast %221 : vector<1x128xf32> to vector<8x128xf32>
    %223 = arith.addf %220, %222 : vector<8x128xf32>
    %cst_56 = arith.constant dense<0xFF800000> : vector<8xf32>
    %224 = vector.multi_reduction <maximumf>, %223, %cst_56 [1] : vector<8x128xf32> to vector<8xf32>
    %225 = vector.shape_cast %224 : vector<8xf32> to vector<8x1xf32>
    %226 = vector.broadcast %225 : vector<8x1xf32> to vector<8x128xf32>
    %227 = arith.subf %223, %226 : vector<8x128xf32>
    %228 = math.exp %227 : vector<8x128xf32>
    %cst_57 = arith.constant dense<0.000000e+00> : vector<8xf32>
    %229 = vector.multi_reduction <add>, %228, %cst_57 [1] : vector<8x128xf32> to vector<8xf32>
    %230 = vector.shape_cast %229 : vector<8xf32> to vector<8x1xf32>
    %231 = vector.broadcast %230 : vector<8x1xf32> to vector<8x128xf32>
    %232 = arith.divf %228, %231 : vector<8x128xf32>
    %c0_58 = arith.constant 0 : index
    %c0_59 = arith.constant 0 : index
    %233 = vector.load %arg9[%c0_58, %c0_59] : memref<8x128xf32, #tpu.memory_space<vmem>>, vector<8x128xf32>
    tpu.vector_store %arg9[%c0_58, %c0_59], %232 {strides = array<i32>} : memref<8x128xf32, #tpu.memory_space<vmem>>, vector<8x128xf32>,
    return
  }
  func.func @transform_0(%arg0: i32) -> (i32, i32, i32) {
    %c0_i32 = arith.constant 0 : i32
    %c0_i32_0 = arith.constant 0 : i32
    %c0_i32_1 = arith.constant 0 : i32
    return %arg0, %c0_i32, %c0_i32_0 : i32, i32, i32
  }
  func.func @transform_1(%arg0: i32) -> (i32, i32) {
    %c0_i32 = arith.constant 0 : i32
    %c0_i32_0 = arith.constant 0 : i32
    %c0_i32_1 = arith.constant 0 : i32
    return %c0_i32, %c0_i32_0 : i32, i32
  }
  func.func @transform_2(%arg0: i32) -> (i32, i32) {
    %c0_i32 = arith.constant 0 : i32
    %c0_i32_0 = arith.constant 0 : i32
    %c0_i32_1 = arith.constant 0 : i32
    return %c0_i32, %c0_i32_0 : i32, i32
  }
  func.func @transform_3(%arg0: i32) -> (i32, i32) {
    %c0_i32 = arith.constant 0 : i32
    %c0_i32_0 = arith.constant 0 : i32
    %c0_i32_1 = arith.constant 0 : i32
    return %c0_i32, %c0_i32_0 : i32, i32
  }
  func.func @transform_4(%arg0: i32) -> (i32, i32) {
    %c0_i32 = arith.constant 0 : i32
    %c0_i32_0 = arith.constant 0 : i32
    %c0_i32_1 = arith.constant 0 : i32
    return %c0_i32, %c0_i32_0 : i32, i32
  }
  func.func @transform_5(%arg0: i32) -> (i32, i32) {
    %c0_i32 = arith.constant 0 : i32
    %c0_i32_0 = arith.constant 0 : i32
    %c0_i32_1 = arith.constant 0 : i32
    return %c0_i32, %c0_i32_0 : i32, i32
  }
  func.func @transform_6(%arg0: i32) -> (i32, i32) {
    %c0_i32 = arith.constant 0 : i32
    %c0_i32_0 = arith.constant 0 : i32
    %c0_i32_1 = arith.constant 0 : i32
    return %c0_i32, %c0_i32_0 : i32, i32
  }
  func.func @transform_7(%arg0: i32) -> (i32, i32) {
    %c0_i32 = arith.constant 0 : i32
    %c0_i32_0 = arith.constant 0 : i32
    %c0_i32_1 = arith.constant 0 : i32
    return %c0_i32, %c0_i32_0 : i32, i32
  }
  func.func @transform_8(%arg0: i32) -> (i32, i32) {
    %c0_i32 = arith.constant 0 : i32
    %c0_i32_0 = arith.constant 0 : i32
    return %arg0, %c0_i32 : i32, i32
  }
}

</mosaic_0001>

<bundles_post_ra>
// kernel: tpu_custom_call.1
= control target key start
LH: loop header
LB: loop body
LE: loop exit
PB: predicated region body
PF: predicated region fallthrough
CT: control target
= control target key end

     0   :  { %13 = vsyncpa [#allocation4], 0  ;;  %s1277_s0 = inlined_call_operand.vmem [shape: bf16[1,64,32], index: 0, kind: input, shape index: {}]   ;;  %s1278_s1 = inlined_call_operand.vmem [shape: bf16[32,128], index: 1, kind: input, shape index: {}]   ;;  %s1279_s2 = inlined_call_operand.hbm [shape: bf16[32,128], index: 2, kind: input, shape index: {}]   ;;  %s1280_s3 = inlined_call_operand.vmem [shape: f32[1,128], index: 3, kind: input, shape index: {}]   ;;  %s1281_s4 = inlined_call_operand.hbm [shape: bf16[32,128], index: 4, kind: input, shape index: {}]   ;;  %s1282_s5 = inlined_call_operand.vmem [shape: f32[1,128], index: 5, kind: input, shape index: {}]   ;;  %s1283_s6 = inlined_call_operand.vmem [shape: bf16[64,128], index: 6, kind: input, shape index: {}]   ;;  %s1284_s7 = inlined_call_operand.vmem [shape: f32[1,128], index: 7, kind: input, shape index: {}]   ;;  %s1285_s8 = inlined_call_operand.hbm [shape: f32[8,128], index: 8, kind: output, shape index: {}]  }
   0x1   :  { %14 = vsyncpa [#allocation7], 0 }
   0x2   :  { %15 = vsyncpa [#allocation5], 0  ;;  %s24_s29 = sshll.u32 %s1279_s2, 4  ;;  %s1087_s30 = smov [#allocation3]   ;;  %s25_s29 = int_to_ptr.hbm [resolvable:$true] %s24_s29 }
   0x3   :  { %s26_s9 = sshll.u32 %s1087_s30, 4  ;;  %s39_s12 = sshll.u32 %s1281_s4, 4  ;;  %s27_s9 = int_to_ptr.vmem [resolvable:$true] %s26_s9  ;;  %s40_s12 = int_to_ptr.hbm [resolvable:$true] %s39_s12 }
   0x4   :  { %s1088_s13 = smov 64   ;;  %s1089_s14 = smov 4  }
   0x5   :  { %32 = dma.hbm_to_vmem [thread:$0]  %s25_s29, 256, %s27_s9, [#allocation4], %s1088_s13, %s1088_s13, %s1089_s14  }
   0x6   :  { %s1090_s15 = smov [#allocation6]  }
   0x7   :  { %s41_s16 = sshll.u32 %s1090_s15, 4  ;;  %s42_s16 = int_to_ptr.vmem [resolvable:$true] %s41_s16 }
   0x8   :  { %47 = dma.hbm_to_vmem [thread:$0]  %s40_s12, 256, %s42_s16, [#allocation7], %s1088_s13, %s1088_s13, %s1089_s14  }
   0x9   :  { %1081 = dma.done.wait [#allocation4], 256  }
   0xa   :  { %1082 = vsyncadd [#allocation4], 4294967040 }
   0xb   :  { %1083 = dma.done.wait [#allocation7], 256  }
   0xc   :  { %1084 = vsyncadd [#allocation7], 4294967040  ;;  %v913_v0 = vld [vmem:[%s1278_s1 + $0x8] sm:$0xff]  ;;  %v912_v2 = vld [vmem:[%s1278_s1] sm:$0xff]  ;;  %vm111_vm0 = vcmask 261120   ;;  %v1091_v5 = vmov 0  }
   0xd   :  { %v1153_v1 = vld [vmem:[#allocation3 + $0x8] sm:$0xff]  ;;  %130 = vmatpush.bf16.msra.mxu0 %v913_v0  ;;  %v1159_v3 = vld [vmem:[#allocation3] sm:$0xff]  ;;  %s1092_s22 = smov 32   ;;  %s819_s19 = sshll.u32 %s1285_s8, 4  ;;  %s820_s19 = int_to_ptr.hbm [resolvable:$true] %s819_s19 }
   0xe   :  { %187 = vmatpush.bf16.msra.mxu1 %v1153_v1  ;;  %247 = vmatpush.bf16.msra.mxu2 %v1153_v1  ;;  %v908_v4 = vld [vmem:[%s1277_s0] sm:$0xff]  ;;  %v909_v61 = vld [vmem:[%s1277_s0 + $0x8] sm:$0xff] }
   0xf   :  { %307 = vmatpush.bf16.msra.mxu3 %v1153_v1  ;;  %v1181_v6 = vld [vmem:[%s1280_s3] ss:$0 sm:$0xff] }
  0x11   :  { %131 = vmatpush.bf16.msra.mxu0 %v912_v2 }
  0x12   :  { %188 = vmatpush.bf16.msra.mxu1 %v1159_v3  ;;  %248 = vmatpush.bf16.msra.mxu2 %v1159_v3 }
  0x13   :  { %308 = vmatpush.bf16.msra.mxu3 %v1159_v3 }
  0x14   :  { %854 = vmatmul.msk.bf16.vlgmr.msra.gmra.mxu0 %vm111_vm0, %v908_v4 }
  0x15   :  { %189 = vmatmul.bf16.vlgmr.msra.gmra.mxu1 %v1091_v5 }
  0x16   :  { %367 = vmatpush.bf16.msrb.mxu1 %v1153_v1  ;;  %427 = vmatpush.bf16.msrb.mxu2 %v1153_v1 }
  0x17   :  { %487 = vmatpush.bf16.msrb.mxu3 %v1153_v1 }
  0x1a   :  { %368 = vmatpush.bf16.msrb.mxu1 %v1159_v3  ;;  %428 = vmatpush.bf16.msrb.mxu2 %v1159_v3 }
  0x1b   :  { %488 = vmatpush.bf16.msrb.mxu3 %v1159_v3 }
  0x1e   :  { %547 = vmatpush.bf16.msra.mxu1 %v1153_v1 }
  0x22   :  { %548 = vmatpush.bf16.msra.mxu1 %v1159_v3 }
  0x24   :  { %855 = vmatmul.msk.bf16.gmra.mxu0 %vm111_vm0, %v909_v61 }
  0x91   :  { %v133_v7 = vpop.f32.mrf.mxu0 }
  0x92   :  { %v190_v8 = vpop.f32.mrf.mxu1  ;;  %v134_v9 = vadd.f32 %v1181_v6, %v133_v7 }
  0x94   :  { %v194_v10 = vadd.f32 %v190_v8, %v134_v9 }
  0x96   :  { %933 = vtanh.f32 %v194_v10  ;;  %v866_v13 = vmul.f32 -1.442695, %v194_v10 }
  0x98   :  { %935 = vpow2.f32 %v866_v13 }
  0x99   :  { %v135_v36 = vpop.f32.mrf.mxu0 }
  0x9a   :  { %v192_v11 = vpop.f32.mrf.mxu1  ;;  %v136_v37 = vadd.f32 %v1181_v6, %v135_v36 }
  0x9c   :  { %v934_v12 = vpop.eup %933 }
  0x9d   :  { %217 = vrot.lane.b32.xlu0 %v934_v12, %s1092_s22 }
  0x9e   :  { %v936_v14 = vpop.eup %935 }
  0x9f   :  { %v198_v15 = vadd.f32 1.0, %v936_v14 }
  0xa1   :  { %937 = vrcp.f32 %v198_v15  ;;  %v210_v21 = vand.u32 2147483648, %v198_v15  ;;  %vm204_vm2 = vweird.f32 %v198_v15  ;;  %v208_v22 = vand.u32 2147483647, %v198_v15  ;;  %v138_v2 = vpop.f32.mrf.mxu0 }
  0xa3   :  { %v211_v24 = vor.u32 1.1754944e-38, %v210_v21  ;;  %vm209_vm4 = vcmp.eq.f32.partialorder %v208_v22, 8.507059e+37 }
  0xa7   :  { %v938_v16 = vpop.eup %937 }
  0xa8   :  { %v200_v17 = vmul.f32 %v938_v16, %v198_v15  ;;  %vm205_vm1 = vweird.f32 %v938_v16 }
  0xa9   :  { %vm206_vm3 = vmor %vm204_vm2, %vm205_vm1 }
  0xaa   :  { %v201_v18 = vsub.f32 1.0, %v200_v17 }
  0xac   :  { %v202_v19 = vmul.f32 %v938_v16, %v201_v18 }
  0xae   :  { %v203_v20 = vadd.f32 %v938_v16, %v202_v19 }
  0xb0   :  { %v207_v23 = vsel %vm206_vm3, %v938_v16, %v203_v20 }
  0xb1   :  { %v212_v26 = vsel %vm209_vm4, %v211_v24, %v207_v23 }
  0xb2   :  { %v215_v28 = vmul.f32 0.0, %v212_v26 }
 0x10f   :  { %v218_v25 = vpop.permute.xlu0 %217 }
 0x110   :  { %v220_v27 = vmul.f32 %v218_v25, %v212_v26 }
 0x112   :  { %222 = vrot.lane.b32.xlu0 %v220_v27, %s1092_s22 }
 0x184   :  { %v223_v29 = vpop.permute.xlu0 %222 }
 0x185   :  { %v225_v30 = vadd.f32 %v223_v29, %v215_v28 }
 0x187   :  { %939 = vtanh.f32 %v225_v30 }
 0x18d   :  { %v940_v31 = vpop.eup %939 }
 0x18e   :  { %228 = vrot.lane.b32.xlu1 %v940_v31, %s1092_s22 }
 0x200   :  { %v229_v32 = vpop.permute.xlu1 %228 }
 0x201   :  { %v231_v33 = vmul.f32 %v229_v32, %v212_v26  ;;  %v140_v32 = vpop.f32.mrf.mxu0 }
 0x203   :  { %v234_v34 = vpack.c.bf16 %v231_v33, %v231_v33  ;;  %v141_v33 = vadd.f32 %v1181_v6, %v140_v32 }
 0x205   :  { %236 = vrot.lane.b32.xlu1 %v234_v34, %s1088_s13 }
 0x277   :  { %v237_v35 = vpop.permute.xlu1 %236 }
 0x278   :  { %867 = vmatmul.msk.bf16.vlgmr.msra.gmra.mxu2 %vm111_vm0, %v237_v35 }
 0x279   :  { %607 = vmatpush.bf16.msra.mxu2 %v1153_v1 }
 0x27d   :  { %608 = vmatpush.bf16.msra.mxu2 %v1159_v3  ;;  %v139_v3 = vadd.f32 %v1181_v6, %v138_v2 }
 0x2fb   :  { %v250_v38 = vpop.f32.mrf.mxu2 }
 0x2fc   :  { %v254_v39 = vadd.f32 %v250_v38, %v136_v37 }
 0x2fe   :  { %941 = vtanh.f32 %v254_v39  ;;  %v868_v42 = vmul.f32 -1.442695, %v254_v39 }
 0x300   :  { %943 = vpow2.f32 %v868_v42 }
 0x303   :  { %v252_v40 = vpop.f32.mrf.mxu2 }
 0x304   :  { %v942_v41 = vpop.eup %941 }
 0x305   :  { %277 = vrot.lane.b32.xlu2 %v942_v41, %s1092_s22 }
 0x306   :  { %v944_v43 = vpop.eup %943 }
 0x307   :  { %v258_v44 = vadd.f32 1.0, %v944_v43 }
 0x309   :  { %945 = vrcp.f32 %v258_v44  ;;  %v270_v50 = vand.u32 2147483648, %v258_v44  ;;  %vm264_vm6 = vweird.f32 %v258_v44  ;;  %v268_v51 = vand.u32 2147483647, %v258_v44 }
 0x30b   :  { %v271_v53 = vor.u32 1.1754944e-38, %v270_v50  ;;  %vm269_vm8 = vcmp.eq.f32.partialorder %v268_v51, 8.507059e+37 }
 0x30f   :  { %v946_v45 = vpop.eup %945 }
 0x310   :  { %v260_v46 = vmul.f32 %v946_v45, %v258_v44  ;;  %vm265_vm5 = vweird.f32 %v946_v45 }
 0x311   :  { %vm266_vm7 = vmor %vm264_vm6, %vm265_vm5 }
 0x312   :  { %v261_v47 = vsub.f32 1.0, %v260_v46 }
 0x314   :  { %v262_v48 = vmul.f32 %v946_v45, %v261_v47 }
 0x316   :  { %v263_v49 = vadd.f32 %v946_v45, %v262_v48 }
 0x318   :  { %v267_v52 = vsel %vm266_vm7, %v946_v45, %v263_v49 }
 0x319   :  { %v272_v55 = vsel %vm269_vm8, %v271_v53, %v267_v52 }
 0x31a   :  { %v275_v57 = vmul.f32 %v272_v55, %v225_v30 }
 0x35f   :  { %v278_v54 = vpop.permute.xlu2 %277 }
 0x360   :  { %v280_v56 = vmul.f32 %v278_v54, %v272_v55 }
 0x362   :  { %282 = vrot.lane.b32.xlu2 %v280_v56, %s1092_s22 }
 0x3bc   :  { %v283_v58 = vpop.permute.xlu2 %282 }
 0x3bd   :  { %v285_v59 = vadd.f32 %v283_v58, %v275_v57  ;;  %v910_v57 = vld [vmem:[%s1277_s0 + $0x10] sm:$0xff] }
 0x3be   :  { %856 = vmatmul.msk.bf16.gmra.mxu0 %vm111_vm0, %v910_v57 }
 0x3bf   :  { %947 = vtanh.f32 %v285_v59 }
 0x3c5   :  { %v948_v60 = vpop.eup %947 }
 0x3c6   :  { %288 = vrot.lane.b32.xlu0 %v948_v60, %s1092_s22 }
 0x438   :  { %v289_v62 = vpop.permute.xlu0 %288 }
 0x439   :  { %v291_v63 = vmul.f32 %v289_v62, %v272_v55 }
 0x43b   :  { %v294_v0 = vpack.c.bf16 %v291_v63, %v291_v63  ;;  %v143_v62 = vpop.f32.mrf.mxu0 }
 0x43c   :  { %v144_v63 = vadd.f32 %v1181_v6, %v143_v62 }
 0x43d   :  { %296 = vrot.lane.b32.xlu1 %v294_v0, %s1088_s13 }
 0x4af   :  { %v297_v1 = vpop.permute.xlu1 %296 }
 0x4b0   :  { %869 = vmatmul.msk.bf16.vlgmr.msra.gmra.mxu3 %vm111_vm0, %v297_v1 }
 0x533   :  { %v310_v4 = vpop.f32.mrf.mxu3 }
 0x534   :  { %v314_v5 = vadd.f32 %v310_v4, %v139_v3 }
 0x536   :  { %949 = vtanh.f32 %v314_v5  ;;  %v870_v9 = vmul.f32 -1.442695, %v314_v5 }
 0x538   :  { %951 = vpow2.f32 %v870_v9 }
 0x53b   :  { %v312_v7 = vpop.f32.mrf.mxu3 }
 0x53c   :  { %v950_v8 = vpop.eup %949 }
 0x53d   :  { %337 = vrot.lane.b32.xlu2 %v950_v8, %s1092_s22 }
 0x53e   :  { %v952_v10 = vpop.eup %951 }
 0x53f   :  { %v318_v11 = vadd.f32 1.0, %v952_v10 }
 0x541   :  { %953 = vrcp.f32 %v318_v11  ;;  %v330_v17 = vand.u32 2147483648, %v318_v11  ;;  %vm324_vm10 = vweird.f32 %v318_v11  ;;  %v328_v18 = vand.u32 2147483647, %v318_v11 }
 0x543   :  { %v331_v20 = vor.u32 1.1754944e-38, %v330_v17  ;;  %vm329_vm12 = vcmp.eq.f32.partialorder %v328_v18, 8.507059e+37 }
 0x547   :  { %v954_v12 = vpop.eup %953 }
 0x548   :  { %v320_v13 = vmul.f32 %v954_v12, %v318_v11  ;;  %vm325_vm9 = vweird.f32 %v954_v12 }
 0x549   :  { %vm326_vm11 = vmor %vm324_vm10, %vm325_vm9 }
 0x54a   :  { %v321_v14 = vsub.f32 1.0, %v320_v13 }
 0x54c   :  { %v322_v15 = vmul.f32 %v954_v12, %v321_v14 }
 0x54e   :  { %v323_v16 = vadd.f32 %v954_v12, %v322_v15 }
 0x550   :  { %v327_v19 = vsel %vm326_vm11, %v954_v12, %v323_v16 }
 0x551   :  { %v332_v22 = vsel %vm329_vm12, %v331_v20, %v327_v19 }
 0x552   :  { %v335_v24 = vmul.f32 %v332_v22, %v285_v59 }
 0x597   :  { %v338_v21 = vpop.permute.xlu2 %337 }
 0x598   :  { %v340_v23 = vmul.f32 %v338_v21, %v332_v22 }
 0x59a   :  { %342 = vrot.lane.b32.xlu0 %v340_v23, %s1092_s22 }
 0x60c   :  { %v343_v25 = vpop.permute.xlu0 %342 }
 0x60d   :  { %v345_v26 = vadd.f32 %v343_v25, %v335_v24 }
 0x60f   :  { %955 = vtanh.f32 %v345_v26 }
 0x615   :  { %v956_v27 = vpop.eup %955 }
 0x616   :  { %348 = vrot.lane.b32.xlu1 %v956_v27, %s1092_s22 }
 0x688   :  { %v349_v28 = vpop.permute.xlu1 %348 }
 0x689   :  { %v351_v29 = vmul.f32 %v349_v28, %v332_v22  ;;  %v145_v28 = vpop.f32.mrf.mxu0 }
 0x68b   :  { %v354_v30 = vpack.c.bf16 %v351_v29, %v351_v29  ;;  %v146_v29 = vadd.f32 %v1181_v6, %v145_v28 }
 0x68d   :  { %356 = vrot.lane.b32.xlu2 %v354_v30, %s1088_s13 }
 0x6e7   :  { %v357_v31 = vpop.permute.xlu2 %356 }
 0x6e8   :  { %871 = vmatmul.msk.bf16.vlgmr.msrb.gmra.mxu1 %vm111_vm0, %v357_v31 }
 0x765   :  { %v370_v34 = vpop.f32.mrf.mxu1 }
 0x766   :  { %v374_v35 = vadd.f32 %v370_v34, %v141_v33 }
 0x768   :  { %957 = vtanh.f32 %v374_v35  ;;  %v872_v38 = vmul.f32 -1.442695, %v374_v35 }
 0x76a   :  { %959 = vpow2.f32 %v872_v38 }
 0x76d   :  { %v372_v36 = vpop.f32.mrf.mxu1 }
 0x76e   :  { %v958_v37 = vpop.eup %957 }
 0x76f   :  { %397 = vrot.lane.b32.xlu0 %v958_v37, %s1092_s22 }
 0x770   :  { %v960_v39 = vpop.eup %959 }
 0x771   :  { %v378_v40 = vadd.f32 1.0, %v960_v39 }
 0x773   :  { %961 = vrcp.f32 %v378_v40  ;;  %v390_v46 = vand.u32 2147483648, %v378_v40  ;;  %vm384_vm14 = vweird.f32 %v378_v40  ;;  %v388_v47 = vand.u32 2147483647, %v378_v40 }
 0x775   :  { %v391_v49 = vor.u32 1.1754944e-38, %v390_v46  ;;  %vm389_vm1 = vcmp.eq.f32.partialorder %v388_v47, 8.507059e+37 }
 0x779   :  { %v962_v41 = vpop.eup %961 }
 0x77a   :  { %v380_v42 = vmul.f32 %v962_v41, %v378_v40  ;;  %vm385_vm13 = vweird.f32 %v962_v41 }
 0x77b   :  { %vm386_vm15 = vmor %vm384_vm14, %vm385_vm13 }
 0x77c   :  { %v381_v43 = vsub.f32 1.0, %v380_v42 }
 0x77e   :  { %v382_v44 = vmul.f32 %v962_v41, %v381_v43 }
 0x780   :  { %v383_v45 = vadd.f32 %v962_v41, %v382_v44 }
 0x782   :  { %v387_v48 = vsel %vm386_vm15, %v962_v41, %v383_v45 }
 0x783   :  { %v392_v51 = vsel %vm389_vm1, %v391_v49, %v387_v48 }
 0x784   :  { %v395_v53 = vmul.f32 %v392_v51, %v345_v26 }
 0x7e1   :  { %v398_v50 = vpop.permute.xlu0 %397 }
 0x7e2   :  { %v400_v52 = vmul.f32 %v398_v50, %v392_v51 }
 0x7e4   :  { %402 = vrot.lane.b32.xlu1 %v400_v52, %s1092_s22 }
 0x856   :  { %v403_v54 = vpop.permute.xlu1 %402 }
 0x857   :  { %v405_v55 = vadd.f32 %v403_v54, %v395_v53  ;;  %v911_v53 = vld [vmem:[%s1277_s0 + $0x18] sm:$0xff] }
 0x858   :  { %857 = vmatmul.msk.bf16.gmra.mxu0 %vm111_vm0, %v911_v53 }
 0x859   :  { %963 = vtanh.f32 %v405_v55 }
 0x85f   :  { %v964_v56 = vpop.eup %963 }
 0x860   :  { %408 = vrot.lane.b32.xlu2 %v964_v56, %s1092_s22 }
 0x8ba   :  { %v409_v58 = vpop.permute.xlu2 %408 }
 0x8bb   :  { %v411_v59 = vmul.f32 %v409_v58, %v392_v51 }
 0x8bd   :  { %v414_v60 = vpack.c.bf16 %v411_v59, %v411_v59 }
 0x8bf   :  { %416 = vrot.lane.b32.xlu0 %v414_v60, %s1088_s13 }
 0x8d5   :  { %v148_v58 = vpop.f32.mrf.mxu0 }
 0x8d6   :  { %v149_v59 = vadd.f32 %v1181_v6, %v148_v58 }
 0x931   :  { %v417_v61 = vpop.permute.xlu0 %416 }
 0x932   :  { %873 = vmatmul.msk.bf16.vlgmr.msrb.gmra.mxu2 %vm111_vm0, %v417_v61 }
 0x9b5   :  { %v430_v0 = vpop.f32.mrf.mxu2 }
 0x9b6   :  { %v434_v1 = vadd.f32 %v430_v0, %v144_v63 }
 0x9b8   :  { %965 = vtanh.f32 %v434_v1  ;;  %v874_v4 = vmul.f32 -1.442695, %v434_v1 }
 0x9ba   :  { %967 = vpow2.f32 %v874_v4 }
 0x9bd   :  { %v432_v2 = vpop.f32.mrf.mxu2 }
 0x9be   :  { %v966_v3 = vpop.eup %965 }
 0x9bf   :  { %457 = vrot.lane.b32.xlu1 %v966_v3, %s1092_s22 }
 0x9c0   :  { %v968_v5 = vpop.eup %967 }
 0x9c1   :  { %v438_v7 = vadd.f32 1.0, %v968_v5 }
 0x9c3   :  { %969 = vrcp.f32 %v438_v7  ;;  %v450_v13 = vand.u32 2147483648, %v438_v7  ;;  %vm444_vm3 = vweird.f32 %v438_v7  ;;  %v448_v14 = vand.u32 2147483647, %v438_v7 }
 0x9c5   :  { %v451_v16 = vor.u32 1.1754944e-38, %v450_v13  ;;  %vm449_vm5 = vcmp.eq.f32.partialorder %v448_v14, 8.507059e+37 }
 0x9c9   :  { %v970_v8 = vpop.eup %969 }
 0x9ca   :  { %v440_v9 = vmul.f32 %v970_v8, %v438_v7  ;;  %vm445_vm2 = vweird.f32 %v970_v8 }
 0x9cb   :  { %vm446_vm4 = vmor %vm444_vm3, %vm445_vm2 }
 0x9cc   :  { %v441_v10 = vsub.f32 1.0, %v440_v9 }
 0x9ce   :  { %v442_v11 = vmul.f32 %v970_v8, %v441_v10 }
 0x9d0   :  { %v443_v12 = vadd.f32 %v970_v8, %v442_v11 }
 0x9d2   :  { %v447_v15 = vsel %vm446_vm4, %v970_v8, %v443_v12 }
 0x9d3   :  { %v452_v18 = vsel %vm449_vm5, %v451_v16, %v447_v15 }
 0x9d4   :  { %v455_v20 = vmul.f32 %v452_v18, %v405_v55 }
 0xa31   :  { %v458_v17 = vpop.permute.xlu1 %457 }
 0xa32   :  { %v460_v19 = vmul.f32 %v458_v17, %v452_v18 }
 0xa34   :  { %462 = vrot.lane.b32.xlu2 %v460_v19, %s1092_s22 }
 0xa8e   :  { %v463_v21 = vpop.permute.xlu2 %462 }
 0xa8f   :  { %v465_v22 = vadd.f32 %v463_v21, %v455_v20  ;;  %v917_v20 = vld [vmem:[#allocation6 + $0x8] sm:$0xff]  ;;  %v916_v21 = vld [vmem:[#allocation6] sm:$0xff] }
 0xa90   :  { %682 = vmatpush.bf16.msra.mxu3 %v917_v20 }
 0xa91   :  { %971 = vtanh.f32 %v465_v22 }
 0xa94   :  { %683 = vmatpush.bf16.msra.mxu3 %v916_v21 }
 0xa97   :  { %v972_v23 = vpop.eup %971 }
 0xa98   :  { %468 = vrot.lane.b32.xlu0 %v972_v23, %s1092_s22 }
 0xb0a   :  { %v469_v24 = vpop.permute.xlu0 %468 }
 0xb0b   :  { %v471_v25 = vmul.f32 %v469_v24, %v452_v18 }
 0xb0d   :  { %v474_v26 = vpack.c.bf16 %v471_v25, %v471_v25 }
 0xb0f   :  { %476 = vrot.lane.b32.xlu1 %v474_v26, %s1088_s13  ;;  %v931_v26 = vld [vmem:[%s1282_s5] ss:$0 sm:$0xff] }
 0xb81   :  { %v477_v27 = vpop.permute.xlu1 %476 }
 0xb82   :  { %875 = vmatmul.msk.bf16.vlgmr.msrb.gmra.mxu3 %vm111_vm0, %v477_v27 }
 0xc05   :  { %v490_v30 = vpop.f32.mrf.mxu3 }
 0xc06   :  { %v494_v31 = vadd.f32 %v490_v30, %v146_v29 }
 0xc08   :  { %973 = vtanh.f32 %v494_v31  ;;  %v876_v34 = vmul.f32 -1.442695, %v494_v31 }
 0xc0a   :  { %975 = vpow2.f32 %v876_v34 }
 0xc0d   :  { %v492_v32 = vpop.f32.mrf.mxu3 }
 0xc0e   :  { %v974_v33 = vpop.eup %973 }
 0xc0f   :  { %517 = vrot.lane.b32.xlu2 %v974_v33, %s1092_s22 }
 0xc10   :  { %v976_v35 = vpop.eup %975 }
 0xc11   :  { %v498_v36 = vadd.f32 1.0, %v976_v35 }
 0xc13   :  { %977 = vrcp.f32 %v498_v36  ;;  %v510_v42 = vand.u32 2147483648, %v498_v36  ;;  %vm504_vm7 = vweird.f32 %v498_v36  ;;  %v508_v43 = vand.u32 2147483647, %v498_v36 }
 0xc15   :  { %v511_v45 = vor.u32 1.1754944e-38, %v510_v42  ;;  %vm509_vm9 = vcmp.eq.f32.partialorder %v508_v43, 8.507059e+37 }
 0xc19   :  { %v978_v37 = vpop.eup %977 }
 0xc1a   :  { %v500_v38 = vmul.f32 %v978_v37, %v498_v36  ;;  %vm505_vm6 = vweird.f32 %v978_v37 }
 0xc1b   :  { %vm506_vm8 = vmor %vm504_vm7, %vm505_vm6  ;;  %vm772_vm7 = vcmask 523264  }
 0xc1c   :  { %v501_v39 = vsub.f32 1.0, %v500_v38 }
 0xc1e   :  { %v502_v40 = vmul.f32 %v978_v37, %v501_v39 }
 0xc20   :  { %v503_v41 = vadd.f32 %v978_v37, %v502_v40 }
 0xc22   :  { %v507_v44 = vsel %vm506_vm8, %v978_v37, %v503_v41  ;;  %v150_v37 = vpop.f32.mrf.mxu0 }
 0xc23   :  { %v512_v47 = vsel %vm509_vm9, %v511_v45, %v507_v44  ;;  %v151_v39 = vadd.f32 %v1181_v6, %v150_v37 }
 0xc24   :  { %v515_v49 = vmul.f32 %v512_v47, %v465_v22  ;;  %v652_v22 = vld [vmem:[%s1277_s0 + $0x1c] sm:$0xf]  ;;  %s1093_s0 = smov 96  }
 0xc25   :  { %889 = vmatmul.msk.bf16.vlgmr.msra.gmra.mxu3 %vm111_vm0, %v652_v22 }
 0xc69   :  { %v518_v46 = vpop.permute.xlu2 %517 }
 0xc6a   :  { %v520_v48 = vmul.f32 %v518_v46, %v512_v47 }
 0xc6c   :  { %522 = vrot.lane.b32.xlu0 %v520_v48, %s1092_s22 }
 0xca8   :  { %v685_v27 = vpop.f32.mrf.mxu3 }
 0xca9   :  { %v686_v28 = vadd.f32 %v931_v26, %v685_v27 }
 0xcab   :  { %v890_v32 = vmul.f32 -1.442695, %v686_v28 }
 0xcb0   :  { %v687_v30 = vpop.f32.mrf.mxu3 }
 0xcde   :  { %v523_v50 = vpop.permute.xlu0 %522 }
 0xcdf   :  { %v525_v51 = vadd.f32 %v523_v50, %v515_v49 }
 0xce1   :  { %979 = vtanh.f32 %v525_v51 }
 0xce7   :  { %v980_v52 = vpop.eup %979 }
 0xce8   :  { %528 = vrot.lane.b32.xlu1 %v980_v52, %s1092_s22 }
 0xd5a   :  { %v529_v54 = vpop.permute.xlu1 %528 }
 0xd5b   :  { %v531_v55 = vmul.f32 %v529_v54, %v512_v47 }
 0xd5d   :  { %v534_v56 = vpack.c.bf16 %v531_v55, %v531_v55 }
 0xd5f   :  { %536 = vrot.lane.b32.xlu2 %v534_v56, %s1088_s13 }
 0xdb9   :  { %v537_v57 = vpop.permute.xlu2 %536 }
 0xdba   :  { %877 = vmatmul.msk.bf16.vlgmr.msra.gmra.mxu1 %vm111_vm0, %v537_v57 }
 0xe37   :  { %v550_v60 = vpop.f32.mrf.mxu1 }
 0xe38   :  { %v554_v61 = vadd.f32 %v550_v60, %v149_v59 }
 0xe3a   :  { %981 = vtanh.f32 %v554_v61  ;;  %v878_v0 = vmul.f32 -1.442695, %v554_v61 }
 0xe3c   :  { %983 = vpow2.f32 %v878_v0 }
 0xe3f   :  { %v552_v62 = vpop.f32.mrf.mxu1 }
 0xe40   :  { %v982_v63 = vpop.eup %981 }
 0xe41   :  { %577 = vrot.lane.b32.xlu0 %v982_v63, %s1092_s22 }
 0xe42   :  { %v984_v1 = vpop.eup %983 }
 0xe43   :  { %v558_v2 = vadd.f32 1.0, %v984_v1 }
 0xe45   :  { %985 = vrcp.f32 %v558_v2  ;;  %v570_v9 = vand.u32 2147483648, %v558_v2  ;;  %vm564_vm11 = vweird.f32 %v558_v2  ;;  %v568_v10 = vand.u32 2147483647, %v558_v2 }
 0xe47   :  { %v571_v12 = vor.u32 1.1754944e-38, %v570_v9  ;;  %vm569_vm13 = vcmp.eq.f32.partialorder %v568_v10, 8.507059e+37 }
 0xe4b   :  { %v986_v3 = vpop.eup %985 }
 0xe4c   :  { %v560_v4 = vmul.f32 %v986_v3, %v558_v2  ;;  %vm565_vm10 = vweird.f32 %v986_v3 }
 0xe4d   :  { %vm566_vm12 = vmor %vm564_vm11, %vm565_vm10 }
 0xe4e   :  { %v561_v5 = vsub.f32 1.0, %v560_v4 }
 0xe50   :  { %v562_v7 = vmul.f32 %v986_v3, %v561_v5 }
 0xe52   :  { %v563_v8 = vadd.f32 %v986_v3, %v562_v7 }
 0xe54   :  { %v567_v11 = vsel %vm566_vm12, %v986_v3, %v563_v8 }
 0xe55   :  { %v572_v14 = vsel %vm569_vm13, %v571_v12, %v567_v11 }
 0xe56   :  { %v575_v16 = vmul.f32 %v572_v14, %v525_v51 }
 0xeb3   :  { %v578_v13 = vpop.permute.xlu0 %577 }
 0xeb4   :  { %v580_v15 = vmul.f32 %v578_v13, %v572_v14 }
 0xeb6   :  { %582 = vrot.lane.b32.xlu1 %v580_v15, %s1092_s22  ;;  %v920_v15 = vld [vmem:[%s1283_s6 + $0x10] sm:$0xff] }
 0xf28   :  { %v583_v17 = vpop.permute.xlu1 %582 }
 0xf29   :  { %v1236_v18 = vadd.f32 %v583_v17, %v575_v16  ;;  %v919_v16 = vld [vmem:[%s1283_s6 + $0x8] sm:$0xff]  ;;  %v918_v17 = vld [vmem:[%s1283_s6] sm:$0xff] }
 0xf2b   :  { %987 = vtanh.f32 %v1236_v18 }
 0xf2c   :  { %989 = vtanh.f32 %v686_v28 }
 0xf2d   :  { %991 = vpow2.f32 %v890_v32 }
 0xf31   :  { %v988_v19 = vpop.eup %987 }
 0xf32   :  { %588 = vrot.lane.b32.xlu2 %v988_v19, %s1092_s22  ;;  %v990_v31 = vpop.eup %989 }
 0xf33   :  { %v992_v33 = vpop.eup %991 }
 0xf34   :  { %v692_v34 = vadd.f32 1.0, %v992_v33 }
 0xf36   :  { %993 = vrcp.f32 %v692_v34  ;;  %vm698_vm14 = vweird.f32 %v692_v34  ;;  %v704_v43 = vand.u32 2147483648, %v692_v34  ;;  %v702_v45 = vand.u32 2147483647, %v692_v34 }
 0xf38   :  { %v705_v46 = vor.u32 1.1754944e-38, %v704_v43  ;;  %vm703_vm2 = vcmp.eq.f32.partialorder %v702_v45, 8.507059e+37 }
 0xf3a   :  { %711 = vrot.lane.b32.xlu2 %v990_v31, %s1092_s22 }
 0xf3c   :  { %v994_v35 = vpop.eup %993 }
 0xf3d   :  { %v694_v36 = vmul.f32 %v994_v35, %v692_v34  ;;  %vm699_vm15 = vweird.f32 %v994_v35 }
 0xf3e   :  { %vm700_vm1 = vmor %vm698_vm14, %vm699_vm15 }
 0xf3f   :  { %v695_v38 = vsub.f32 1.0, %v694_v36 }
 0xf41   :  { %v696_v41 = vmul.f32 %v994_v35, %v695_v38 }
 0xf43   :  { %v697_v44 = vadd.f32 %v994_v35, %v696_v41 }
 0xf45   :  { %v701_v48 = vsel %vm700_vm1, %v994_v35, %v697_v44 }
 0xf46   :  { %v706_v51 = vsel %vm703_vm2, %v705_v46, %v701_v48 }
 0xf47   :  { %v709_v3 = vmul.f32 0.0, %v706_v51 }
 0xf8c   :  { %v589_v23 = vpop.permute.xlu2 %588 }
 0xf8d   :  { %v591_v24 = vmul.f32 %v589_v23, %v572_v14  ;;  %v921_v14 = vld [vmem:[%s1283_s6 + $0x18] sm:$0xff]  ;;  %s1094_s6 = smov [#allocation8]  }
 0xf8e   :  { %780 = vmatpush.bf16.msrb.mxu1 %v921_v14 }
 0xf8f   :  { %v594_v25 = vpack.c.bf16 %v591_v24, %v591_v24  ;;  %v932_v24 = vld [vmem:[%s1284_s7] ss:$0 sm:$0xff]  ;;  %s817_s7 = sshll.u32 %s1094_s6, 4  ;;  %s818_s7 = int_to_ptr.vmem [resolvable:$true] %s817_s7 }
 0xf91   :  { %596 = vrot.lane.b32.xlu0 %v594_v25, %s1088_s13 }
 0xf92   :  { %781 = vmatpush.bf16.msrb.mxu1 %v920_v15 }
 0xf94   :  { %v712_v50 = vpop.permute.xlu2 %711 }
 0xf95   :  { %v714_v6 = vmul.f32 %v712_v50, %v706_v51 }
 0xf96   :  { %782 = vmatpush.bf16.msrb.mxu1 %v919_v16 }
 0xf9a   :  { %783 = vmatpush.bf16.msrb.mxu1 %v918_v17 }
0x1003   :  { %v597_v29 = vpop.permute.xlu0 %596 }
0x1004   :  { %879 = vmatmul.msk.bf16.vlgmr.msra.gmra.mxu2 %vm111_vm0, %v597_v29 }
0x1087   :  { %v610_v40 = vpop.f32.mrf.mxu2 }
0x1088   :  { %v614_v42 = vadd.f32 %v610_v40, %v151_v39 }
0x108a   :  { %995 = vtanh.f32 %v614_v42  ;;  %v880_v52 = vmul.f32 -1.442695, %v614_v42 }
0x108c   :  { %997 = vpow2.f32 %v880_v52 }
0x108f   :  { %v612_v47 = vpop.f32.mrf.mxu2 }
0x1090   :  { %v996_v49 = vpop.eup %995 }
0x1091   :  { %637 = vrot.lane.b32.xlu1 %v996_v49, %s1092_s22 }
0x1092   :  { %v998_v53 = vpop.eup %997 }
0x1093   :  { %v618_v54 = vadd.f32 1.0, %v998_v53 }
0x1095   :  { %999 = vrcp.f32 %v618_v54  ;;  %v630_v60 = vand.u32 2147483648, %v618_v54  ;;  %vm624_vm4 = vweird.f32 %v618_v54  ;;  %v628_v61 = vand.u32 2147483647, %v618_v54 }
0x1097   :  { %v631_v63 = vor.u32 1.1754944e-38, %v630_v60  ;;  %vm629_vm6 = vcmp.eq.f32.partialorder %v628_v61, 8.507059e+37 }
0x1099   :  { %716 = vrot.lane.b32.xlu1 %v714_v6, %s1092_s22 }
0x109b   :  { %v1000_v55 = vpop.eup %999 }
0x109c   :  { %v620_v56 = vmul.f32 %v1000_v55, %v618_v54  ;;  %vm625_vm3 = vweird.f32 %v1000_v55 }
0x109d   :  { %vm626_vm5 = vmor %vm624_vm4, %vm625_vm3 }
0x109e   :  { %v621_v57 = vsub.f32 1.0, %v620_v56 }
0x10a0   :  { %v622_v58 = vmul.f32 %v1000_v55, %v621_v57 }
0x10a2   :  { %v623_v59 = vadd.f32 %v1000_v55, %v622_v58 }
0x10a4   :  { %v627_v62 = vsel %vm626_vm5, %v1000_v55, %v623_v59 }
0x10a5   :  { %v632_v1 = vsel %vm629_vm6, %v631_v63, %v627_v62 }
0x10a6   :  { %v635_v8 = vmul.f32 %v632_v1, %v1236_v18 }
0x1103   :  { %v638_v0 = vpop.permute.xlu1 %637 }
0x1104   :  { %v640_v2 = vmul.f32 %v638_v0, %v632_v1 }
0x1106   :  { %642 = vrot.lane.b32.xlu0 %v640_v2, %s1092_s22 }
0x110b   :  { %v717_v4 = vpop.permute.xlu1 %716 }
0x110c   :  { %v719_v5 = vadd.f32 %v717_v4, %v709_v3 }
0x110e   :  { %1001 = vtanh.f32 %v719_v5 }
0x1114   :  { %v1002_v7 = vpop.eup %1001 }
0x1115   :  { %722 = vrot.lane.b32.xlu0 %v1002_v7, %s1092_s22 }
0x1178   :  { %v643_v9 = vpop.permute.xlu0 %642 }
0x1179   :  { %v645_v10 = vadd.f32 %v643_v9, %v635_v8 }
0x117b   :  { %1003 = vtanh.f32 %v645_v10 }
0x1181   :  { %v1004_v11 = vpop.eup %1003 }
0x1182   :  { %648 = vrot.lane.b32.xlu2 %v1004_v11, %s1092_s22 }
0x1187   :  { %v723_v12 = vpop.permute.xlu0 %722 }
0x1188   :  { %v725_v13 = vmul.f32 %v723_v12, %v706_v51 }
0x118a   :  { %731 = vrot.lane.b32.xlu2 %v725_v13, %s1093_s0 }
0x11dc   :  { %v649_v18 = vpop.permute.xlu2 %648 }
0x11dd   :  { %v651_v19 = vmul.f32 %v649_v18, %v632_v1 }
0x11df   :  { %727 = vrot.lane.b32.xlu1 %v651_v19, %s1088_s13 }
0x11e4   :  { %v732_v20 = vpop.permute.xlu2 %731 }
0x1251   :  { %v728_v21 = vpop.permute.xlu1 %727 }
0x1252   :  { %v734_v22 = vsel %vm111_vm0, %v728_v21, %v732_v20 }
0x1253   :  { %v735_v23 = vpack.c.bf16 %v734_v22, %v734_v22 }
0x1255   :  { %907 = vmatmul.msk.bf16.vlgmr.msrb.gmra.mxu1 %vm772_vm7, %v735_v23 }
0x12d2   :  { %v785_v25 = vpop.f32.mrf.mxu1 }
0x12d3   :  { %v786_v26 = vadd.f32 %v932_v24, %v785_v25 }
0x12d5   :  { %789 = vmax.xlane.f32.xlu0 %v786_v26 }
0x12da   :  { %v787_v27 = vpop.f32.mrf.mxu1 }
0x1348   :  { %v790_v28 = vpop.xlane.xlu0 %789 }
0x1349   :  { %v791_v29 = vsub.f32 %v786_v26, %v790_v28 }
0x134b   :  { %v792_v30 = vmul.f32 1.442695, %v791_v29 }
0x134d   :  { %1005 = vpow2.f32 %v792_v30 }
0x1353   :  { %v1006_v31 = vpop.eup %1005 }
0x1354   :  { %794 = vadd.xlane.f32.xlu1 %v1006_v31 }
0x13c7   :  { %v795_v32 = vpop.xlane.xlu1 %794 }
0x13c8   :  { %1007 = vrcp.f32 %v795_v32  ;;  %v807_v36 = vand.u32 2147483648, %v795_v32  ;;  %v805_v38 = vand.u32 2147483647, %v795_v32  ;;  %vm801_vm8 = vweird.f32 %v795_v32 }
0x13ca   :  { %v808_v40 = vor.u32 1.1754944e-38, %v807_v36  ;;  %vm806_vm10 = vcmp.eq.f32.partialorder %v805_v38, 8.507059e+37 }
0x13ce   :  { %v1008_v33 = vpop.eup %1007 }
0x13cf   :  { %v797_v34 = vmul.f32 %v1008_v33, %v795_v32  ;;  %vm802_vm0 = vweird.f32 %v1008_v33 }
0x13d0   :  { %vm803_vm9 = vmor %vm801_vm8, %vm802_vm0 }
0x13d1   :  { %v798_v35 = vsub.f32 1.0, %v797_v34 }
0x13d3   :  { %v799_v37 = vmul.f32 %v1008_v33, %v798_v35 }
0x13d5   :  { %v800_v39 = vadd.f32 %v1008_v33, %v799_v37 }
0x13d7   :  { %v804_v41 = vsel %vm803_vm9, %v1008_v33, %v800_v39 }
0x13d8   :  { %v809_v42 = vsel %vm806_vm10, %v808_v40, %v804_v41 }
0x13d9   :  { %v810_v43 = vmul.f32 %v1006_v31, %v809_v42 }
0x13db   :  { %811 = vst [vmem:[#allocation8] sm:$0xff] %v810_v43 }
0x13dc   :  { %822 = dma.vmem_to_hbm [thread:$0]  %s818_s7, 128, %s820_s19, [#allocation5]  }
0x13dd   :  { %1085 = dma.done.wait [#allocation5], 128  }
0x13de   :  { %1086 = vsyncadd [#allocation5], 4294967168 }
0x13df   :  { %827 = vsyncpa [#allocation4], 1 }
0x13e0   :  { %828 = vsyncpa [#allocation7], 1 }
0x13e1   :  { %829 = vsyncpa [#allocation5], 1 }

</bundles_post_ra>
